<compile_context>
chip_gen: v6e
topology: v6e:2x2x1
jax: 0.10.0
libtpu: 0.0.40
codegen_flags: <defaults>
</compile_context>

<pallas_src>
import functools

import jax
import jax.numpy as jnp
from jax.experimental import pallas as pl
from jax.experimental.pallas import tpu as pltpu


def _round_up(x, m):
    return (x + m - 1) // m * m


def _pad2d(a, rows, cols):
    return jnp.pad(a, ((0, rows - a.shape[0]), (0, cols - a.shape[1])))


def _vmem_limit_bytes():
    # v5e/v6e: 128 MiB physical (16/32 MiB scoped default); v7x: 64 MiB per TC.
    cap = 64 * 1024 * 1024
    try:
        info = pltpu.get_tpu_info()
        cap = int(getattr(info, "vmem_capacity_bytes", cap)) or cap
    except Exception:
        pass
    # Leave headroom for compiler scratch / pipeline buffers.
    return min((cap * 3) // 4, 100 * 1024 * 1024)


def fused_gcn_kernel(adj_ref, xw0_ref, b0_ref, w1_ref, b1_ref,
                     o_ref, hw1_s, *, adj_resident):
    """Grid = (2 phases, row tiles).  phase 0: H1W1 rows -> scratch,
    phase 1: out rows = Ahat_tile @ (H1 @ W1) + b1."""
    phase = pl.program_id(0)
    i = pl.program_id(1)
    tm = o_ref.shape[0]
    row = pl.multiple_of(i * tm, tm)

    def adj_tile():
        if adj_resident:
            # Full Ahat resident in VMEM (fetched once); slice the row stripe.
            return adj_ref[pl.ds(row, tm), :]
        return adj_ref[...]  # streamed (tm, N) stripe

    @pl.when(phase == 0)
    def _():
        # H1_tile = relu(Ahat_tile @ XW0 + b0); fold W1 immediately so phase 1's
        # NxN matmul also has a lane-dense (128-wide) bf16 RHS.
        h1 = jnp.maximum(
            jnp.dot(adj_tile(), xw0_ref[...],
                    preferred_element_type=jnp.float32) + b0_ref[...],
            0.0)
        hw1_s[pl.ds(row, tm), :] = jnp.dot(
            h1.astype(w1_ref.dtype), w1_ref[...],
            preferred_element_type=jnp.float32).astype(hw1_s.dtype)

    @pl.when(phase == 1)
    def _():
        o_ref[...] = (
            jnp.dot(adj_tile(), hw1_s[...],
                    preferred_element_type=jnp.float32) + b1_ref[...]
        ).astype(o_ref.dtype)


def net_attack_forward(adj_hat, features, params, *, tm=256):
    n = adj_hat.shape[0]
    hidden = params["w0"].shape[1]
    labels = params["w1"].shape[1]

    lane = 128
    n_pad = _round_up(n, tm)
    h_pad = _round_up(hidden, lane)
    o_pad = _round_up(labels, lane)

    # Layer-0 feature transform hoisted to XLA (reassociation Ahat @ (X @ W0));
    # it is <1% of FLOPs/bytes and removes one full pass over the N^2 adjacency.
    xw0 = features.astype(jnp.float32) @ params["w0"].astype(jnp.float32)

    adj_p = _pad2d(adj_hat.astype(jnp.float32), n_pad, n_pad).astype(jnp.bfloat16)
    xw0_p = _pad2d(xw0, n_pad, h_pad).astype(jnp.bfloat16)
    b0_p = _pad2d(params["b0"].reshape(1, -1).astype(jnp.float32), 1, h_pad)
    w1_p = _pad2d(params["w1"].astype(jnp.float32), h_pad, o_pad).astype(jnp.bfloat16)
    b1_p = _pad2d(params["b1"].reshape(1, -1).astype(jnp.float32), 1, o_pad)

    r = n_pad // tm
    vmem_limit = _vmem_limit_bytes()
    # Whole-Ahat residency (bf16, assume double-buffered) if it uses <1/3 of budget.
    adj_resident = 4 * n_pad * n_pad <= vmem_limit // 3

    if adj_resident:
        adj_spec = pl.BlockSpec((n_pad, n_pad), lambda p, i: (0, 0))
    else:
        adj_spec = pl.BlockSpec((tm, n_pad), lambda p, i: (i, 0))

    kernel = functools.partial(fused_gcn_kernel, adj_resident=adj_resident)

    out = pl.pallas_call(
        kernel,
        out_shape=jax.ShapeDtypeStruct((n_pad, o_pad), jnp.float32),
        grid=(2, r),  # (phase, row tile); phase is the outer (slow) axis
        in_specs=[
            adj_spec,                                           # Ahat (bf16)
            pl.BlockSpec((n_pad, h_pad), lambda p, i: (0, 0)),  # XW0  (bf16, fetched once)
            pl.BlockSpec((1, h_pad), lambda p, i: (0, 0)),      # b0   (f32)
            pl.BlockSpec((h_pad, o_pad), lambda p, i: (0, 0)),  # W1   (bf16)
            pl.BlockSpec((1, o_pad), lambda p, i: (0, 0)),      # b1   (f32)
        ],
        # Gated writeback: phase 0 keeps revisiting block (0,0) (never flushed with
        # garbage), phase 1 writes each row tile exactly once.  Valid because the
        # phase axis is outer and strictly sequential.
        out_specs=pl.BlockSpec((tm, o_pad), lambda p, i: (i * p, 0)),
        scratch_shapes=[
            pltpu.VMEM((n_pad, o_pad), jnp.bfloat16),  # H1 @ W1 (persists over grid)
        ],
        compiler_params=pltpu.CompilerParams(
            # Phase-1 row tiles depend on ALL phase-0 rows via the scratch, so both
            # grid axes must stay sequential on one TensorCore.
            dimension_semantics=("arbitrary", "arbitrary"),
            vmem_limit_bytes=vmem_limit,
        ),
    )(adj_p, xw0_p, b0_p, w1_p, b1_p)

    return out[:n, :labels]


def normalized_adjacency(adj):
    # Ahat = D^-1/2 (A + I) D^-1/2  (self loops so no zero in-degree)
    n = adj.shape[0]
    a = adj + jnp.eye(n, dtype=adj.dtype)
    deg = jnp.sum(a, axis=1)
    d_inv_sqrt = 1.0 / jnp.sqrt(deg)
    return a * d_inv_sqrt[:, None] * d_inv_sqrt[None, :]


if __name__ == "__main__":
    # Small, deterministic problem: 8 nodes, 32 input features, 16 hidden, 4 labels.
    N = 8
    feature_number = 32
    hidden = 16
    label_number = 4

    key = jax.random.PRNGKey(0)
    k_adj, k_feat, k_w0, k_b0, k_w1, k_b1 = jax.random.split(key, 6)

    # Random symmetric 0/1 adjacency (no checkpoint / no dgl graph object).
    raw = jax.random.uniform(k_adj, (N, N))
    sym = (raw + raw.T) * 0.5
    adj = (sym > 0.5).astype(jnp.float32)
    adj = adj * (1.0 - jnp.eye(N, dtype=jnp.float32))  # strip diag, re-add in norm
    adj_hat = normalized_adjacency(adj)

    features = jax.random.normal(k_feat, (N, feature_number), dtype=jnp.float32)

    # Deterministic parameter init (GraphConv: weight [in, out], bias [out]).
    params = {
        "w0": jax.random.normal(k_w0, (feature_number, hidden), dtype=jnp.float32)
        * (1.0 / jnp.sqrt(feature_number)),
        "b0": jax.random.normal(k_b0, (hidden,), dtype=jnp.float32) * 0.01,
        "w1": jax.random.normal(k_w1, (hidden, label_number), dtype=jnp.float32)
        * (1.0 / jnp.sqrt(hidden)),
        "b1": jax.random.normal(k_b1, (label_number,), dtype=jnp.float32) * 0.01,
    }

    out = net_attack_forward(adj_hat, features, params)
    out = jax.block_until_ready(out)

    # Pure-JAX f32 reference (kernel runs the N^2 matmuls in bf16 with f32 accumulation,
    # hence the loosened tolerance).
    ref = jnp.maximum(adj_hat @ features @ params["w0"] + params["b0"], 0.0)
    ref = adj_hat @ ref @ params["w1"] + params["b1"]
    assert out.shape == (N, label_number)
    assert jnp.allclose(out, ref, atol=5e-2, rtol=5e-2)

    print("KERNEL_OK")
</pallas_src>

<mosaic_0001>
module attributes {stable_mosaic.version = 11 : i64} {
  func.func @fused_gcn_kernel(%arg0: i32, %arg1: i32, %arg2: memref<256x256xbf16, #tpu.memory_space<vmem>>, %arg3: memref<256x128xbf16, #tpu.memory_space<vmem>>, %arg4: memref<1x128xf32, #tpu.memory_space<vmem>>, %arg5: memref<128x128xbf16, #tpu.memory_space<vmem>>, %arg6: memref<1x128xf32, #tpu.memory_space<vmem>>, %arg7: memref<256x128xf32, #tpu.memory_space<vmem>>, %arg8: memref<256x128xbf16, #tpu.memory_space<vmem>>) attributes {dimension_semantics = [#tpu.dimension_semantics<arbitrary>, #tpu.dimension_semantics<arbitrary>], iteration_bounds = array<i64: 2, 1>, scalar_prefetch = 0 : i64, scratch_operands = 1 : i64, tpu.core_type = #tpu.core_type<tc>, window_params = [{pipeline_mode = #tpu.pipeline_mode<synchronous>, transform_indices = @transform_0, window_bounds = array<i64: 256, 256>}, {pipeline_mode = #tpu.pipeline_mode<synchronous>, transform_indices = @transform_1, window_bounds = array<i64: 256, 128>}, {pipeline_mode = #tpu.pipeline_mode<synchronous>, transform_indices = @transform_2, window_bounds = array<i64: 1, 128>}, {pipeline_mode = #tpu.pipeline_mode<synchronous>, transform_indices = @transform_3, window_bounds = array<i64: 128, 128>}, {pipeline_mode = #tpu.pipeline_mode<synchronous>, transform_indices = @transform_4, window_bounds = array<i64: 1, 128>}, {transform_indices = @transform_5, window_bounds = array<i64: 256, 128>}]} {
    %c256_i32 = arith.constant 256 : i32
    %0 = arith.muli %arg1, %c256_i32 : i32
    %1 = tpu.assume_multiple %0, 256 : i32
    %c0_i32 = arith.constant 0 : i32
    %2 = arith.cmpi eq, %arg0, %c0_i32 : i32
    %3 = arith.extui %2 : i1 to i32
    %c0_i32_0 = arith.constant 0 : i32
    %4 = arith.cmpi ne, %3, %c0_i32_0 : i32
    scf.if %4 {
      %8 = arith.index_cast %1 : i32 to index
      %c0 = arith.constant 0 : index
      %9 = vector.load %arg2[%8, %c0] : memref<256x256xbf16, #tpu.memory_space<vmem>>, vector<256x256xbf16>
      %c0_2 = arith.constant 0 : index
      %c0_3 = arith.constant 0 : index
      %10 = vector.load %arg3[%c0_2, %c0_3] : memref<256x128xbf16, #tpu.memory_space<vmem>>, vector<256x128xbf16>
      %cst = arith.constant dense<0.000000e+00> : vector<256x128xf32>
      %11 = tpu.matmul %9, %10, %cst {dimension_numbers = #tpu.dot_dimension_numbers<[1], [0], [0], [1], [0, 0, 1, 1], [], []>} : vector<256x256xbf16>, vector<256x128xbf16>, vector<256x128xf32> -> vector<256x128xf32>
      %c0_4 = arith.constant 0 : index
      %c0_5 = arith.constant 0 : index
      %12 = vector.load %arg4[%c0_4, %c0_5] : memref<1x128xf32, #tpu.memory_space<vmem>>, vector<1x128xf32>
      %13 = vector.broadcast %12 : vector<1x128xf32> to vector<256x128xf32>
      %14 = arith.addf %11, %13 : vector<256x128xf32>
      %cst_6 = arith.constant 0.000000e+00 : f32
      %15 = vector.broadcast %cst_6 : f32 to vector<256x128xf32>
      %16 = arith.maximumf %14, %15 : vector<256x128xf32>
      %17 = arith.truncf %16 : vector<256x128xf32> to vector<256x128xbf16>
      %c0_7 = arith.constant 0 : index
      %c0_8 = arith.constant 0 : index
      %18 = vector.load %arg5[%c0_7, %c0_8] : memref<128x128xbf16, #tpu.memory_space<vmem>>, vector<128x128xbf16>
      %cst_9 = arith.constant dense<0.000000e+00> : vector<256x128xf32>
      %19 = tpu.matmul %17, %18, %cst_9 {dimension_numbers = #tpu.dot_dimension_numbers<[1], [0], [0], [1], [0, 0, 1, 1], [], []>} : vector<256x128xbf16>, vector<128x128xbf16>, vector<256x128xf32> -> vector<256x128xf32>
      %20 = arith.truncf %19 : vector<256x128xf32> to vector<256x128xbf16>
      %21 = arith.index_cast %1 : i32 to index
      %c0_10 = arith.constant 0 : index
      %22 = vector.load %arg8[%21, %c0_10] : memref<256x128xbf16, #tpu.memory_space<vmem>>, vector<256x128xbf16>
      tpu.vector_store %arg8[%21, %c0_10], %20 {strides = array<i32>} : memref<256x128xbf16, #tpu.memory_space<vmem>>, vector<256x128xbf16>,
    } else {
    }
    %c1_i32 = arith.constant 1 : i32
    %5 = arith.cmpi eq, %arg0, %c1_i32 : i32
    %6 = arith.extui %5 : i1 to i32
    %c0_i32_1 = arith.constant 0 : i32
    %7 = arith.cmpi ne, %6, %c0_i32_1 : i32
    scf.if %7 {
      %8 = arith.index_cast %1 : i32 to index
      %c0 = arith.constant 0 : index
      %9 = vector.load %arg2[%8, %c0] : memref<256x256xbf16, #tpu.memory_space<vmem>>, vector<256x256xbf16>
      %c0_2 = arith.constant 0 : index
      %c0_3 = arith.constant 0 : index
      %10 = vector.load %arg8[%c0_2, %c0_3] : memref<256x128xbf16, #tpu.memory_space<vmem>>, vector<256x128xbf16>
      %cst = arith.constant dense<0.000000e+00> : vector<256x128xf32>
      %11 = tpu.matmul %9, %10, %cst {dimension_numbers = #tpu.dot_dimension_numbers<[1], [0], [0], [1], [0, 0, 1, 1], [], []>} : vector<256x256xbf16>, vector<256x128xbf16>, vector<256x128xf32> -> vector<256x128xf32>
      %c0_4 = arith.constant 0 : index
      %c0_5 = arith.constant 0 : index
      %12 = vector.load %arg6[%c0_4, %c0_5] : memref<1x128xf32, #tpu.memory_space<vmem>>, vector<1x128xf32>
      %13 = vector.broadcast %12 : vector<1x128xf32> to vector<256x128xf32>
      %14 = arith.addf %11, %13 : vector<256x128xf32>
      %c0_6 = arith.constant 0 : index
      %c0_7 = arith.constant 0 : index
      %15 = vector.load %arg7[%c0_6, %c0_7] : memref<256x128xf32, #tpu.memory_space<vmem>>, vector<256x128xf32>
      tpu.vector_store %arg7[%c0_6, %c0_7], %14 {strides = array<i32>} : memref<256x128xf32, #tpu.memory_space<vmem>>, vector<256x128xf32>,
    } else {
    }
    return
  }
  func.func @transform_0(%arg0: i32, %arg1: i32) -> (i32, i32) {
    %c0_i32 = arith.constant 0 : i32
    %c0_i32_0 = arith.constant 0 : i32
    %c0_i32_1 = arith.constant 0 : i32
    return %c0_i32, %c0_i32_0 : i32, i32
  }
  func.func @transform_1(%arg0: i32, %arg1: i32) -> (i32, i32) {
    %c0_i32 = arith.constant 0 : i32
    %c0_i32_0 = arith.constant 0 : i32
    %c0_i32_1 = arith.constant 0 : i32
    return %c0_i32, %c0_i32_0 : i32, i32
  }
  func.func @transform_2(%arg0: i32, %arg1: i32) -> (i32, i32) {
    %c0_i32 = arith.constant 0 : i32
    %c0_i32_0 = arith.constant 0 : i32
    %c0_i32_1 = arith.constant 0 : i32
    return %c0_i32, %c0_i32_0 : i32, i32
  }
  func.func @transform_3(%arg0: i32, %arg1: i32) -> (i32, i32) {
    %c0_i32 = arith.constant 0 : i32
    %c0_i32_0 = arith.constant 0 : i32
    %c0_i32_1 = arith.constant 0 : i32
    return %c0_i32, %c0_i32_0 : i32, i32
  }
  func.func @transform_4(%arg0: i32, %arg1: i32) -> (i32, i32) {
    %c0_i32 = arith.constant 0 : i32
    %c0_i32_0 = arith.constant 0 : i32
    %c0_i32_1 = arith.constant 0 : i32
    return %c0_i32, %c0_i32_0 : i32, i32
  }
  func.func @transform_5(%arg0: i32, %arg1: i32) -> (i32, i32) {
    %0 = arith.muli %arg1, %arg0 : i32
    %c0_i32 = arith.constant 0 : i32
    %c0_i32_0 = arith.constant 0 : i32
    return %0, %c0_i32 : i32, i32
  }
}

</mosaic_0001>

<bundles_post_ra>
// kernel: tpu_custom_call.1
= control target key start
LH: loop header
LB: loop body
LE: loop exit
PB: predicated region body
PF: predicated region fallthrough
CT: control target
= control target key end

     0   :  { %10 = vsyncpa [#allocation4], 0  ;;  %s3039_s0 = inlined_call_operand.hbm [shape: bf16[256,256], index: 0, kind: input, shape index: {}]   ;;  %s3040_s1 = inlined_call_operand.hbm [shape: bf16[256,128], index: 1, kind: input, shape index: {}]   ;;  %s3041_s2 = inlined_call_operand.vmem [shape: f32[1,128], index: 2, kind: input, shape index: {}]   ;;  %s3042_s3 = inlined_call_operand.hbm [shape: bf16[128,128], index: 3, kind: input, shape index: {}]   ;;  %s3043_s4 = inlined_call_operand.vmem [shape: f32[1,128], index: 4, kind: input, shape index: {}]   ;;  %s3044_s5 = inlined_call_operand.hbm [shape: f32[256,128], index: 5, kind: output, shape index: {}]  }
   0x1   :  { %11 = vsyncpa [#allocation7], 0 }
   0x2   :  { %12 = vsyncpa [#allocation5], 0 }
   0x3   :  { %14 = vsyncpa [#allocation5 + $0x1], 0  ;;  %s2832_s18 = smov 0   ;;  %s2834_s19 = smov 0  }
   0x4   :  { %s2836_s20 = smov 0  }
   0x5 LB: > { %s2792_s21 = smov [#allocation6]   ;;  %s1836_s23 = sadd.s32 4294967295, %s2790_s20   ;;  %s2790_s20 = sphi %s2836_s20, %s20_s20   ;;  %s2786_s19 = sphi %s2834_s19, %s3051_s19   ;;  %s2782_s18 = sphi %s2832_s18, %s3050_s18  }
   0x6   : > { %s195_s22 = sshll.u32 %s2792_s21, 4  ;;  %s1837_s24 = sadd.s32 4294967294, %s2790_s20   ;;  %s196_s22 = int_to_ptr.vmem [resolvable:$true] %s195_s22 }
   0x7   : > { %p1838_p0 = scmp.ge.s32.totalorder %s2790_s20, 1  ;;  %p170_p1 = scmp.lt.s32.totalorder %s2790_s20, 3 }
   0x8   : > { %p2853_p2 = scmp.eq.s32.totalorder %s1836_s23, 0  ;;  %s32_s28 = sadd.s32 1, %s2786_s19 }
   0x9   : > { %p2857_p3 = pnand %p1838_p0, %p170_p1  ;;  %p2870_p6 = scmp.ge.s32.totalorder %s32_s28, 2 }
   0xa   : > { %s2665_s30 = scalar_lea.vmem %s196_s22, 2048  ;;  %p2673_p11 = scmp.lt.s32.totalorder %s196_s22, %s196_s22 }
   0xb   : > { %p2461_p4 = pneg %p2857_p3  ;;  %p2666_p8 = scmp.ne.s32.totalorder %s196_s22, %s2665_s30 }
   0xc   : > { %p2674_p12 = scmp.lt.s32.totalorder %s2665_s30, %s2665_s30 }
   0xd   : > { %p2865_p5 = pnand %p2853_p2, %p2461_p4 }
   0xe   : > { %p2675_p13 = por %p2674_p12, %p2673_p11 }
   0xf   : > { %p2656_p7 = pneg %p2865_p5 }
  0x11   : > { %p2668_p9 = pnand %p2666_p8, %p2656_p7 }
  0x13   : > { %p2669_p10 = pneg %p2668_p9 }
  0x15   : > { %p2676_p0 = pnand %p2675_p13, %p2669_p10 }
  0x17   : > { %2679 = shalt.err (!%p2676_p0)
}
  0x18   : > { %s2793_s6 = smov 64   ;;  %s2794_s7 = smov 4  }
  0x19   : > { %2467 = dma.hbm_to_vmem [thread:$0]  (!%p2865_p5), %s3040_s1, 2048, %s196_s22, [#allocation7], %s2793_s6, %s2793_s6, %s2794_s7  }
  0x1a   : > { %s3053_s28 = smov (%p2870_p6, %s32_s28), 0  ;;  %s2795_s10 = smov [#allocation3]  }
  0x1b   : > { %s182_s11 = sshll.u32 %s2795_s10, 4  ;;  %s183_s11 = int_to_ptr.vmem [resolvable:$true] %s182_s11 }
  0x1c   : > { %s2691_s12 = scalar_lea.vmem %s183_s11, 4096  ;;  %p2699_p9 = scmp.lt.s32.totalorder %s183_s11, %s183_s11 }
  0x1d   : > { %p2692_p1 = scmp.ne.s32.totalorder %s183_s11, %s2691_s12  ;;  %p2700_p10 = scmp.lt.s32.totalorder %s2691_s12, %s2691_s12 }
  0x1f   : > { %p2694_p4 = pnand %p2692_p1, %p2656_p7  ;;  %p2701_p11 = por %p2700_p10, %p2699_p9 }
  0x21   : > { %p2695_p8 = pneg %p2694_p4 }
  0x23   : > { %p2702_p12 = pnand %p2701_p11, %p2695_p8 }
  0x25   : > { %2705 = shalt.err (!%p2702_p12)
}
  0x26   : > { %s2796_s13 = smov 128   ;;  %s2797_s14 = smov 8  }
  0x27   : > { %2464 = dma.hbm_to_vmem [thread:$0]  (!%p2865_p5), %s3039_s0, 4096, %s183_s11, [#allocation4], %s2796_s13, %s2796_s13, %s2797_s14  }
  0x28   : > { %s2798_s17 = smov [#allocation8]  }
  0x29   : > { %s211_s21 = sshll.u32 %s2798_s17, 4  ;;  %s212_s21 = int_to_ptr.vmem [resolvable:$true] %s211_s21 }
  0x2a   : > { %s2717_s22 = scalar_lea.vmem %s212_s21, 1024  ;;  %p2725_p1 = scmp.lt.s32.totalorder %s212_s21, %s212_s21 }
  0x2b   : > { %p2718_p6 = scmp.ne.s32.totalorder %s212_s21, %s2717_s22  ;;  %p2726_p4 = scmp.lt.s32.totalorder %s2717_s22, %s2717_s22 }
  0x2d   : > { %p2720_p13 = pnand %p2718_p6, %p2656_p7  ;;  %p2727_p8 = por %p2726_p4, %p2725_p1 }
  0x2f   : > { %p2721_p0 = pneg %p2720_p13 }
  0x31   : > { %p2728_p9 = pnand %p2727_p8, %p2721_p0 }
  0x33   : > { %2731 = shalt.err (!%p2728_p9)
}
  0x34   : > { %2470 = dma.hbm_to_vmem [thread:$0]  (!%p2865_p5), %s3042_s3, 1024, %s212_s21, [#allocation7], %s2793_s6, %s2793_s6, %s2794_s7  }
  0x35   : > { %230 = sbr.rel (%p2857_p3) target bundleno = 928 (0x3a0), region = 40 }
  0x3a   : > { %2769 = dma.done.wait (%p2853_p2), [#allocation4], 4096  }
  0x3b   : > { %2771 = vsyncadd (%p2853_p2), [#allocation4], 4294963200 }
  0x3c   : > { %2773 = dma.done.wait (%p2853_p2), [#allocation7], 3072  }
  0x3d   : > { %2775 = vsyncadd (%p2853_p2), [#allocation7], 4294964224  ;;  %p1846_p7 = scmp.ne.s32.totalorder %s2782_s18, 0 }
  0x3f   : > { %268 = sbr.rel (%p1846_p7) target bundleno = 614 (0x266), region = 56 }
  0x44   : > { %v2518_v0 = vld [vmem:[#allocation6 + $0x78] sm:$0xff]   ;;  %v2520_v2 = vld [vmem:[#allocation6 + $0x70] sm:$0xff]   ;;  %v2522_v4 = vld [vmem:[#allocation6 + $0x68] sm:$0xff]  }
  0x45   : > { %v2519_v1 = vld [vmem:[#allocation6 + $0x38] sm:$0xff]   ;;  %2117 = vmatprep.subr.bf16.mxu0 %v2518_v0  ;;  %2413 = vmatprep.subr.bf16.mxu1 %v2518_v0  ;;  %v2521_v3 = vld [vmem:[#allocation6 + $0x30] sm:$0xff]   ;;  %v2523_v5 = vld [vmem:[#allocation6 + $0x28] sm:$0xff]  }
  0x46   : > { %2118 = vmatpush3.bf16.msra.mxu0 %v2519_v1  ;;  %2421 = vmatpush3.bf16.msra.mxu1 %v2519_v1  ;;  %v2524_v6 = vld [vmem:[#allocation6 + $0x60] sm:$0xff]   ;;  %v2526_v8 = vld [vmem:[#allocation6 + $0x58] sm:$0xff]   ;;  %v2528_v10 = vld [vmem:[#allocation6 + $0x50] sm:$0xff]  }
  0x47   : > { %2119 = vmatprep.subr.bf16.mxu0 %v2520_v2  ;;  %2414 = vmatprep.subr.bf16.mxu1 %v2520_v2  ;;  %v2525_v7 = vld [vmem:[#allocation6 + $0x20] sm:$0xff]   ;;  %v2527_v9 = vld [vmem:[#allocation6 + $0x18] sm:$0xff]   ;;  %v2529_v12 = vld [vmem:[#allocation6 + $0x10] sm:$0xff]  }
  0x48   : > { %v2536_v11 = vld [vmem:[#allocation3 + $0x4] ss:$8 sps:$4 sm:$0xff]   ;;  %v2534_v17 = vld [vmem:[#allocation3] ss:$8 sps:$4 sm:$0xff]   ;;  %v2537_v19 = vld [vmem:[#allocation3 + $0x14] ss:$8 sps:$4 sm:$0xff]  }
  0x49   : > { %633 = vmatprep.mubr.bf16.mxu0 %v2536_v11  ;;  %v2530_v13 = vld [vmem:[#allocation6 + $0x48] sm:$0xff]   ;;  %v2532_v15 = vld [vmem:[#allocation6 + $0x40] sm:$0xff]   ;;  %v2570_v21 = vld [vmem:[#allocation3 + $0xd4] ss:$8 sps:$4 sm:$0xff]  }
  0x4a   : > { %2120 = vmatpush3.bf16.msra.mxu0 %v2521_v3  ;;  %2422 = vmatpush3.bf16.msra.mxu1 %v2521_v3  ;;  %v2531_v14 = vld [vmem:[#allocation6 + $0x8] sm:$0xff]   ;;  %v2533_v16 = vld [vmem:[#allocation6] sm:$0xff]   ;;  %v2539_v22 = vld [vmem:[#allocation3 + $0x10] ss:$8 sps:$4 sm:$0xff]  }
  0x4b   : > { %2121 = vmatprep.subr.bf16.mxu0 %v2522_v4  ;;  %2415 = vmatprep.subr.bf16.mxu1 %v2522_v4  ;;  %v2566_v18 = vld [vmem:[#allocation3 + $0xc4] ss:$8 sps:$4 sm:$0xff]   ;;  %v2564_v20 = vld [vmem:[#allocation3 + $0xc0] ss:$8 sps:$4 sm:$0xff]   ;;  %v2572_v24 = vld [vmem:[#allocation3 + $0xd0] ss:$8 sps:$4 sm:$0xff]  }
  0x4c   : > { %729 = vmatprep.mubr.bf16.mxu1 %v2566_v18  ;;  %v2540_v23 = vld [vmem:[#allocation3 + $0x24] ss:$8 sps:$4 sm:$0xff]   ;;  %v2582_v26 = vld [vmem:[#allocation8 + $0x38] sm:$0xff]   ;;  %v2583_v27 = vld [vmem:[#allocation8 + $0x30] sm:$0xff]  }
  0x4d   : > { %v2576_v25 = vld [vmem:[#allocation3 + $0xe4] ss:$8 sps:$4 sm:$0xff]   ;;  %v2542_v29 = vld [vmem:[#allocation3 + $0x20] ss:$8 sps:$4 sm:$0xff]   ;;  %v2543_v30 = vld [vmem:[#allocation3 + $0x34] ss:$8 sps:$4 sm:$0xff]  }
  0x4e   : > { %2122 = vmatpush3.bf16.msra.mxu0 %v2523_v5  ;;  %2423 = vmatpush3.bf16.msra.mxu1 %v2523_v5  ;;  %v2584_v28 = vld [vmem:[#allocation8 + $0x28] sm:$0xff]   ;;  %v2579_v32 = vld [vmem:[#allocation3 + $0xf4] ss:$8 sps:$4 sm:$0xff]   ;;  %v2545_v33 = vld [vmem:[#allocation3 + $0x30] ss:$8 sps:$4 sm:$0xff]  }
  0x4f   : > { %2123 = vmatprep.subr.bf16.mxu0 %v2524_v6  ;;  %2416 = vmatprep.subr.bf16.mxu1 %v2524_v6  ;;  %v2578_v31 = vld [vmem:[#allocation3 + $0xe0] ss:$8 sps:$4 sm:$0xff]   ;;  %v2546_v34 = vld [vmem:[#allocation3 + $0x44] ss:$8 sps:$4 sm:$0xff]   ;;  %v2581_v35 = vld [vmem:[#allocation3 + $0xf0] ss:$8 sps:$4 sm:$0xff]  }
  0x50   : > { %v2548_v36 = vld [vmem:[#allocation3 + $0x40] ss:$8 sps:$4 sm:$0xff]   ;;  %v2549_v37 = vld [vmem:[#allocation3 + $0x54] ss:$8 sps:$4 sm:$0xff]   ;;  %v2551_v38 = vld [vmem:[#allocation3 + $0x50] ss:$8 sps:$4 sm:$0xff]  }
  0x51   : > { %v2552_v39 = vld [vmem:[#allocation3 + $0x64] ss:$8 sps:$4 sm:$0xff]   ;;  %v2554_v40 = vld [vmem:[#allocation3 + $0x60] ss:$8 sps:$4 sm:$0xff]   ;;  %v2555_v41 = vld [vmem:[#allocation3 + $0x74] ss:$8 sps:$4 sm:$0xff]  }
  0x52   : > { %2124 = vmatpush3.bf16.msra.mxu0 %v2525_v7  ;;  %2424 = vmatpush3.bf16.msra.mxu1 %v2525_v7  ;;  %v2557_v42 = vld [vmem:[#allocation3 + $0x70] ss:$8 sps:$4 sm:$0xff]   ;;  %v2558_v43 = vld [vmem:[#allocation3 + $0x84] ss:$8 sps:$4 sm:$0xff]   ;;  %v2560_v44 = vld [vmem:[#allocation3 + $0x80] ss:$8 sps:$4 sm:$0xff]  }
  0x53   : > { %2125 = vmatprep.subr.bf16.mxu0 %v2526_v8  ;;  %2417 = vmatprep.subr.bf16.mxu1 %v2526_v8  ;;  %v2561_v45 = vld [vmem:[#allocation3 + $0x94] ss:$8 sps:$4 sm:$0xff]   ;;  %v2585_v46 = vld [vmem:[#allocation8 + $0x20] sm:$0xff]   ;;  %v2563_v47 = vld [vmem:[#allocation3 + $0x90] ss:$8 sps:$4 sm:$0xff]  }
  0x54   : > { %v2567_v48 = vld [vmem:[#allocation3 + $0xa4] ss:$8 sps:$4 sm:$0xff]   ;;  %v2586_v49 = vld [vmem:[#allocation8 + $0x18] sm:$0xff]   ;;  %v2587_v50 = vld [vmem:[#allocation8 + $0x10] sm:$0xff]  }
  0x55   : > { %v2569_v51 = vld [vmem:[#allocation3 + $0xa0] ss:$8 sps:$4 sm:$0xff]   ;;  %v2573_v52 = vld [vmem:[#allocation3 + $0xb4] ss:$8 sps:$4 sm:$0xff]   ;;  %v2575_v55 = vld [vmem:[#allocation3 + $0xb0] ss:$8 sps:$4 sm:$0xff]  }
  0x56   : > { %2126 = vmatpush3.bf16.msra.mxu0 %v2527_v9  ;;  %2425 = vmatpush3.bf16.msra.mxu1 %v2527_v9  ;;  %v2588_v53 = vld [vmem:[#allocation8 + $0x8] sm:$0xff]   ;;  %v2589_v54 = vld [vmem:[#allocation8] sm:$0xff]  }
  0x57   : > { %2127 = vmatprep.subr.bf16.mxu0 %v2528_v10  ;;  %2418 = vmatprep.subr.bf16.mxu1 %v2528_v10  ;;  %v2924_v59 = vld [vmem:[%s3041_s2] ss:$0 sm:$0xff] }
  0x5a   : > { %2128 = vmatpush3.bf16.msra.mxu0 %v2529_v12  ;;  %2426 = vmatpush3.bf16.msra.mxu1 %v2529_v12 }
  0x5b   : > { %2129 = vmatprep.subr.bf16.mxu0 %v2530_v13  ;;  %2419 = vmatprep.subr.bf16.mxu1 %v2530_v13 }
  0x5e   : > { %2130 = vmatpush3.bf16.msra.mxu0 %v2531_v14  ;;  %2427 = vmatpush3.bf16.msra.mxu1 %v2531_v14 }
  0x5f   : > { %2131 = vmatprep.subr.bf16.mxu0 %v2532_v15  ;;  %2420 = vmatprep.subr.bf16.mxu1 %v2532_v15 }
  0x62   : > { %2132 = vmatpush3.bf16.msra.mxu0 %v2533_v16  ;;  %2428 = vmatpush3.bf16.msra.mxu1 %v2533_v16 }
  0x63   : > { %2365 = vmatprep.subr.bf16.mxu1 %v2582_v26 }
  0x65   : > { %634 = vmatmul.mubr.bf16.vlgmr.msra.gmra.mxu0 %v2534_v17  ;;  %730 = vmatmul.mubr.bf16.vlgmr.msra.gmra.mxu1 %v2564_v20 }
  0x66   : > { %641 = vmatprep.mubr.bf16.mxu0 %v2537_v19  ;;  %737 = vmatprep.mubr.bf16.mxu1 %v2570_v21 }
  0x67   : > { %2366 = vmatpush3.bf16.msra.mxu1 %v2582_v26 }
  0x68   : > { %2367 = vmatprep.subr.bf16.mxu1 %v2583_v27 }
  0x6b   : > { %2368 = vmatpush3.bf16.msra.mxu1 %v2583_v27 }
  0x6c   : > { %2369 = vmatprep.subr.bf16.mxu1 %v2584_v28 }
  0x6d   : > { %642 = vmatmul.mubr.bf16.gmra.mxu0 %v2539_v22  ;;  %738 = vmatmul.mubr.bf16.gmra.mxu1 %v2572_v24 }
  0x6e   : > { %649 = vmatprep.mubr.bf16.mxu0 %v2540_v23  ;;  %745 = vmatprep.mubr.bf16.mxu1 %v2576_v25 }
  0x6f   : > { %2370 = vmatpush3.bf16.msra.mxu1 %v2584_v28 }
  0x70   : > { %2371 = vmatprep.subr.bf16.mxu1 %v2585_v46 }
  0x73   : > { %2372 = vmatpush3.bf16.msra.mxu1 %v2585_v46 }
  0x74   : > { %2373 = vmatprep.subr.bf16.mxu1 %v2586_v49 }
  0x75   : > { %650 = vmatmul.mubr.bf16.gmra.mxu0 %v2542_v29  ;;  %746 = vmatmul.mubr.bf16.gmra.mxu1 %v2578_v31 }
  0x76   : > { %657 = vmatprep.mubr.bf16.mxu0 %v2543_v30  ;;  %753 = vmatprep.mubr.bf16.mxu1 %v2579_v32 }
  0x77   : > { %2374 = vmatpush3.bf16.msra.mxu1 %v2586_v49 }
  0x78   : > { %2375 = vmatprep.subr.bf16.mxu1 %v2587_v50 }
  0x7b   : > { %2376 = vmatpush3.bf16.msra.mxu1 %v2587_v50 }
  0x7c   : > { %2377 = vmatprep.subr.bf16.mxu1 %v2588_v53 }
  0x7d   : > { %658 = vmatmul.mubr.bf16.gmra.mxu0 %v2545_v33  ;;  %754 = vmatmul.mubr.bf16.gmra.mxu1 %v2581_v35 }
  0x7e   : > { %665 = vmatprep.mubr.bf16.mxu0 %v2546_v34 }
  0x7f   : > { %2378 = vmatpush3.bf16.msra.mxu1 %v2588_v53 }
  0x80   : > { %2379 = vmatprep.subr.bf16.mxu1 %v2589_v54 }
  0x83   : > { %2380 = vmatpush3.bf16.msra.mxu1 %v2589_v54 }
  0x85   : > { %666 = vmatmul.mubr.bf16.gmra.mxu0 %v2548_v36 }
  0x86   : > { %673 = vmatprep.mubr.bf16.mxu0 %v2549_v37 }
  0x8d   : > { %674 = vmatmul.mubr.bf16.gmra.mxu0 %v2551_v38 }
  0x8e   : > { %681 = vmatprep.mubr.bf16.mxu0 %v2552_v39 }
  0x95   : > { %682 = vmatmul.mubr.bf16.gmra.mxu0 %v2554_v40 }
  0x96   : > { %689 = vmatprep.mubr.bf16.mxu0 %v2555_v41 }
  0x9d   : > { %690 = vmatmul.mubr.bf16.gmra.mxu0 %v2557_v42 }
  0x9e   : > { %697 = vmatprep.mubr.bf16.mxu0 %v2558_v43 }
  0xa5   : > { %698 = vmatmul.mubr.bf16.gmra.mxu0 %v2560_v44 }
  0xa6   : > { %705 = vmatprep.mubr.bf16.mxu0 %v2561_v45 }
  0xad   : > { %706 = vmatmul.mubr.bf16.gmra.mxu0 %v2563_v47 }
  0xae   : > { %713 = vmatprep.mubr.bf16.mxu0 %v2567_v48 }
  0xb5   : > { %714 = vmatmul.mubr.bf16.gmra.mxu0 %v2569_v51 }
  0xb6   : > { %721 = vmatprep.mubr.bf16.mxu0 %v2573_v52 }
  0xbd   : > { %722 = vmatmul.mubr.bf16.gmra.mxu0 %v2575_v55 }
 0x125   : > { %v2133_v56 = vpop.f32.mrf.mxu0  ;;  %v2936_v47 = vpop.f32.mrf.mxu1 }
 0x127   : > { %v2134_v57 = vpop.f32.mrf.mxu0  ;;  %v2938_v54 = vpop.f32.mrf.mxu1 }
 0x128   : > { %v2135_v58 = vadd.f32 %v2134_v57, %v2133_v56 }
 0x129   : > { %v2136_v60 = vpop.f32.mrf.mxu0 }
 0x12a   : > { %v636_v62 = vadd.f32 %v2135_v58, %v2924_v59 }
 0x12b   : > { %v2137_v61 = vpop.f32.mrf.mxu0 }
 0x12c   : > { %v2138_v63 = vadd.f32 %v2137_v61, %v2136_v60  ;;  %v762_v3 = vmax.f32 %v636_v62, 0.0  ;;  %v2942_v61 = vpop.f32.mrf.mxu1 }
 0x12d   : > { %v2139_v0 = vpop.f32.mrf.mxu0 }
 0x12e   : > { %v639_v1 = vadd.f32 %v2138_v63, %v2924_v59 }
 0x12f   : > { %v2140_v2 = vpop.f32.mrf.mxu0 }
 0x130   : > { %v763_v4 = vmax.f32 %v639_v1, 0.0  ;;  %v2141_v5 = vadd.f32 %v2140_v2, %v2139_v0 }
 0x131   : > { %v2142_v6 = vpop.f32.mrf.mxu0 }
 0x132   : > { %v794_v7 = vpack.c.bf16 %v763_v4, %v762_v3  ;;  %v644_v9 = vadd.f32 %v2141_v5, %v2924_v59  ;;  %v2944_v4 = vpop.f32.mrf.mxu1 }
 0x133   : > { %v2143_v8 = vpop.f32.mrf.mxu0 }
 0x134   : > { %v2144_v10 = vadd.f32 %v2143_v8, %v2142_v6  ;;  %2381 = vmatprep.mubr.bf16.mxu1 %v794_v7  ;;  %v764_v14 = vmax.f32 %v644_v9, 0.0 }
 0x135   : > { %v2145_v11 = vpop.f32.mrf.mxu0 }
 0x136   : > { %v647_v12 = vadd.f32 %v2144_v10, %v2924_v59  ;;  %v2948_v10 = vpop.f32.mrf.mxu1 }
 0x137   : > { %v2146_v13 = vpop.f32.mrf.mxu0 }
 0x138   : > { %v765_v15 = vmax.f32 %v647_v12, 0.0  ;;  %v2147_v16 = vadd.f32 %v2146_v13, %v2145_v11 }
 0x139   : > { %v2148_v17 = vpop.f32.mrf.mxu0 }
 0x13a   : > { %v795_v18 = vpack.c.bf16 %v765_v15, %v764_v14  ;;  %v652_v20 = vadd.f32 %v2147_v16, %v2924_v59 }
 0x13b   : > { %v2149_v19 = vpop.f32.mrf.mxu0 }
 0x13c   : > { %v2150_v21 = vadd.f32 %v2149_v19, %v2148_v17  ;;  %2382 = vmatmul.mubr.bf16.vlgmr.msra.gmra.mxu1 %v795_v18  ;;  %v766_v25 = vmax.f32 %v652_v20, 0.0  ;;  %v2950_v17 = vpop.f32.mrf.mxu1 }
 0x13d   : > { %v2151_v22 = vpop.f32.mrf.mxu0 }
 0x13e   : > { %v655_v23 = vadd.f32 %v2150_v21, %v2924_v59 }
 0x13f   : > { %v2152_v24 = vpop.f32.mrf.mxu0 }
 0x140   : > { %v767_v26 = vmax.f32 %v655_v23, 0.0  ;;  %v2153_v27 = vadd.f32 %v2152_v24, %v2151_v22  ;;  %v2214_v23 = vpop.f32.mrf.mxu1 }
 0x141   : > { %v2154_v28 = vpop.f32.mrf.mxu0 }
 0x142   : > { %v796_v29 = vpack.c.bf16 %v767_v26, %v766_v25  ;;  %v660_v31 = vadd.f32 %v2153_v27, %v2924_v59 }
 0x143   : > { %v2155_v30 = vpop.f32.mrf.mxu0 }
 0x144   : > { %v2156_v32 = vadd.f32 %v2155_v30, %v2154_v28  ;;  %2385 = vmatprep.mubr.bf16.mxu1 %v796_v29  ;;  %v768_v36 = vmax.f32 %v660_v31, 0.0  ;;  %v2215_v30 = vpop.f32.mrf.mxu1 }
 0x145   : > { %v2157_v33 = vpop.f32.mrf.mxu0 }
 0x146   : > { %v663_v34 = vadd.f32 %v2156_v32, %v2924_v59 }
 0x147   : > { %v2158_v35 = vpop.f32.mrf.mxu0 }
 0x148   : > { %v769_v37 = vmax.f32 %v663_v34, 0.0  ;;  %v2159_v38 = vadd.f32 %v2158_v35, %v2157_v33 }
 0x149   : > { %v2160_v39 = vpop.f32.mrf.mxu0 }
 0x14a   : > { %v797_v40 = vpack.c.bf16 %v769_v37, %v768_v36  ;;  %v668_v42 = vadd.f32 %v2159_v38, %v2924_v59  ;;  %v2217_v36 = vpop.f32.mrf.mxu1 }
 0x14b   : > { %v2161_v41 = vpop.f32.mrf.mxu0 }
 0x14c   : > { %v2162_v43 = vadd.f32 %v2161_v41, %v2160_v39  ;;  %2386 = vmatmul.mubr.bf16.gmra.mxu1 %v797_v40  ;;  %v770_v48 = vmax.f32 %v668_v42, 0.0 }
 0x14d   : > { %v2163_v44 = vpop.f32.mrf.mxu0 }
 0x14e   : > { %v671_v45 = vadd.f32 %v2162_v43, %v2924_v59  ;;  %v2218_v43 = vpop.f32.mrf.mxu1 }
 0x14f   : > { %v2164_v46 = vpop.f32.mrf.mxu0 }
 0x150   : > { %v771_v49 = vmax.f32 %v671_v45, 0.0  ;;  %v2165_v50 = vadd.f32 %v2164_v46, %v2163_v44 }
 0x151   : > { %v2166_v51 = vpop.f32.mrf.mxu0 }
 0x152   : > { %v798_v52 = vpack.c.bf16 %v771_v49, %v770_v48  ;;  %v676_v55 = vadd.f32 %v2165_v50, %v2924_v59  ;;  %v2220_v50 = vpop.f32.mrf.mxu1 }
 0x153   : > { %v2167_v53 = vpop.f32.mrf.mxu0 }
 0x154   : > { %v2168_v56 = vadd.f32 %v2167_v53, %v2166_v51  ;;  %2389 = vmatprep.mubr.bf16.mxu1 %v798_v52  ;;  %v772_v62 = vmax.f32 %v676_v55, 0.0 }
 0x155   : > { %v2169_v57 = vpop.f32.mrf.mxu0 }
 0x156   : > { %v679_v58 = vadd.f32 %v2168_v56, %v2924_v59 }
 0x157   : > { %v2170_v60 = vpop.f32.mrf.mxu0 }
 0x158   : > { %v773_v63 = vmax.f32 %v679_v58, 0.0  ;;  %v2171_v0 = vadd.f32 %v2170_v60, %v2169_v57  ;;  %v2221_v58 = vpop.f32.mrf.mxu1 }
 0x159   : > { %v2172_v1 = vpop.f32.mrf.mxu0 }
 0x15a   : > { %v799_v2 = vpack.c.bf16 %v773_v63, %v772_v62  ;;  %v684_v5 = vadd.f32 %v2171_v0, %v2924_v59 }
 0x15b   : > { %v2173_v3 = vpop.f32.mrf.mxu0 }
 0x15c   : > { %v2174_v6 = vadd.f32 %v2173_v3, %v2172_v1  ;;  %2390 = vmatmul.mubr.bf16.gmra.mxu1 %v799_v2  ;;  %v774_v11 = vmax.f32 %v684_v5, 0.0  ;;  %v2207_v1 = vadd.f32 %v2938_v54, %v2936_v47  ;;  %v2210_v2 = vadd.f32 %v2944_v4, %v2942_v61  ;;  %v2223_v5 = vpop.f32.mrf.mxu1 }
 0x15d   : > { %v2175_v7 = vpop.f32.mrf.mxu0  ;;  %v2213_v47 = vadd.f32 %v2950_v17, %v2948_v10  ;;  %v2216_v54 = vadd.f32 %v2215_v30, %v2214_v23 }
 0x15e   : > { %v687_v8 = vadd.f32 %v2174_v6, %v2924_v59 }
 0x15f   : > { %v2176_v9 = vpop.f32.mrf.mxu0 }
 0x160   : > { %v775_v12 = vmax.f32 %v687_v8, 0.0  ;;  %v2177_v13 = vadd.f32 %v2176_v9, %v2175_v7 }
 0x161   : > { %v2178_v14 = vpop.f32.mrf.mxu0 }
 0x162   : > { %v800_v15 = vpack.c.bf16 %v775_v12, %v774_v11  ;;  %v692_v18 = vadd.f32 %v2177_v13, %v2924_v59  ;;  %v732_v12 = vadd.f32 %v2207_v1, %v2924_v59  ;;  %v735_v13 = vadd.f32 %v2210_v2, %v2924_v59 }
 0x163   : > { %v2179_v16 = vpop.f32.mrf.mxu0 }
 0x164   : > { %v2180_v19 = vadd.f32 %v2179_v16, %v2178_v14  ;;  %2393 = vmatprep.mubr.bf16.mxu1 %v800_v15  ;;  %v776_v24 = vmax.f32 %v692_v18, 0.0  ;;  %v2224_v15 = vpop.f32.mrf.mxu1  ;;  %v786_v4 = vmax.f32 %v732_v12, 0.0 }
 0x165   : > { %v2181_v20 = vpop.f32.mrf.mxu0 }
 0x166   : > { %v695_v21 = vadd.f32 %v2180_v19, %v2924_v59  ;;  %v787_v19 = vmax.f32 %v735_v13, 0.0 }
 0x167   : > { %v2182_v22 = vpop.f32.mrf.mxu0 }
 0x168   : > { %v777_v25 = vmax.f32 %v695_v21, 0.0  ;;  %v2183_v26 = vadd.f32 %v2182_v22, %v2181_v20  ;;  %v2219_v20 = vadd.f32 %v2218_v43, %v2217_v36  ;;  %v2222_v21 = vadd.f32 %v2221_v58, %v2220_v50  ;;  %v2226_v22 = vpop.f32.mrf.mxu1 }
 0x169   : > { %v2184_v27 = vpop.f32.mrf.mxu0  ;;  %v806_v17 = vpack.c.bf16 %v787_v19, %v786_v4 }
 0x16a   : > { %v801_v28 = vpack.c.bf16 %v777_v25, %v776_v24  ;;  %v700_v31 = vadd.f32 %v2183_v26, %v2924_v59  ;;  %v740_v26 = vadd.f32 %v2213_v47, %v2924_v59  ;;  %v2227_v10 = vpop.f32.mrf.mxu1 }
 0x16b   : > { %v2185_v29 = vpop.f32.mrf.mxu0 }
 0x16c   : > { %v2186_v32 = vadd.f32 %v2185_v29, %v2184_v27  ;;  %2394 = vmatmul.mubr.bf16.gmra.mxu1 %v801_v28  ;;  %v778_v37 = vmax.f32 %v700_v31, 0.0  ;;  %v743_v27 = vadd.f32 %v2216_v54, %v2924_v59  ;;  %v748_v29 = vadd.f32 %v2219_v20, %v2924_v59 }
 0x16d   : > { %v2187_v33 = vpop.f32.mrf.mxu0  ;;  %v751_v31 = vadd.f32 %v2222_v21, %v2924_v59  ;;  %v788_v23 = vmax.f32 %v740_v26, 0.0 }
 0x16e   : > { %v703_v34 = vadd.f32 %v2186_v32, %v2924_v59  ;;  %v789_v30 = vmax.f32 %v743_v27, 0.0  ;;  %v2225_v32 = vadd.f32 %v2224_v15, %v2223_v5 }
 0x16f   : > { %v2188_v35 = vpop.f32.mrf.mxu0 }
 0x170   : > { %v779_v38 = vmax.f32 %v703_v34, 0.0  ;;  %v2189_v39 = vadd.f32 %v2188_v35, %v2187_v33  ;;  %v2228_v33 = vadd.f32 %v2227_v10, %v2226_v22  ;;  %v790_v34 = vmax.f32 %v748_v29, 0.0 }
 0x171   : > { %v2190_v40 = vpop.f32.mrf.mxu0  ;;  %v791_v35 = vmax.f32 %v751_v31, 0.0  ;;  %v756_v36 = vadd.f32 %v2225_v32, %v2924_v59 }
 0x172   : > { %v802_v41 = vpack.c.bf16 %v779_v38, %v778_v37  ;;  %v708_v44 = vadd.f32 %v2189_v39, %v2924_v59  ;;  %v759_v37 = vadd.f32 %v2228_v33, %v2924_v59  ;;  %v807_v38 = vpack.c.bf16 %v789_v30, %v788_v23 }
 0x173   : > { %v2191_v42 = vpop.f32.mrf.mxu0  ;;  %v808_v39 = vpack.c.bf16 %v791_v35, %v790_v34 }
 0x174   : > { %v2192_v45 = vadd.f32 %v2191_v42, %v2190_v40  ;;  %2397 = vmatprep.mubr.bf16.mxu1 %v802_v41  ;;  %v780_v51 = vmax.f32 %v708_v44, 0.0  ;;  %v792_v40 = vmax.f32 %v756_v36, 0.0  ;;  %v793_v41 = vmax.f32 %v759_v37, 0.0 }
 0x175   : > { %v2193_v46 = vpop.f32.mrf.mxu0 }
 0x176   : > { %v711_v48 = vadd.f32 %v2192_v45, %v2924_v59  ;;  %v809_v42 = vpack.c.bf16 %v793_v41, %v792_v40 }
 0x177   : > { %v2194_v49 = vpop.f32.mrf.mxu0 }
 0x178   : > { %v781_v52 = vmax.f32 %v711_v48, 0.0  ;;  %v2195_v53 = vadd.f32 %v2194_v49, %v2193_v46 }
 0x179   : > { %v2196_v55 = vpop.f32.mrf.mxu0 }
 0x17a   : > { %v803_v56 = vpack.c.bf16 %v781_v52, %v780_v51  ;;  %v716_v60 = vadd.f32 %v2195_v53, %v2924_v59 }
 0x17b   : > { %v2197_v57 = vpop.f32.mrf.mxu0 }
 0x17c   : > { %v2198_v62 = vadd.f32 %v2197_v57, %v2196_v55  ;;  %2398 = vmatmul.mubr.bf16.gmra.mxu1 %v803_v56  ;;  %v782_v6 = vmax.f32 %v716_v60, 0.0 }
 0x17d   : > { %v2199_v63 = vpop.f32.mrf.mxu0 }
 0x17e   : > { %v719_v0 = vadd.f32 %v2198_v62, %v2924_v59 }
 0x17f   : > { %v2200_v3 = vpop.f32.mrf.mxu0 }
 0x180   : > { %v783_v7 = vmax.f32 %v719_v0, 0.0  ;;  %v2201_v8 = vadd.f32 %v2200_v3, %v2199_v63 }
 0x181   : > { %v2202_v9 = vpop.f32.mrf.mxu0 }
 0x182   : > { %v804_v11 = vpack.c.bf16 %v783_v7, %v782_v6  ;;  %v724_v16 = vadd.f32 %v2201_v8, %v2924_v59 }
 0x183   : > { %v2203_v14 = vpop.f32.mrf.mxu0 }
 0x184   : > { %v2204_v18 = vadd.f32 %v2203_v14, %v2202_v9  ;;  %2401 = vmatprep.mubr.bf16.mxu1 %v804_v11  ;;  %v784_v24 = vmax.f32 %v724_v16, 0.0 }
 0x186   : > { %v727_v61 = vadd.f32 %v2204_v18, %v2924_v59 }
 0x188   : > { %v785_v25 = vmax.f32 %v727_v61, 0.0 }
 0x18a   : > { %v805_v28 = vpack.c.bf16 %v785_v25, %v784_v24 }
 0x18c   : > { %2402 = vmatmul.mubr.bf16.gmra.mxu1 %v805_v28 }
 0x18d   : > { %2405 = vmatprep.mubr.bf16.mxu1 %v806_v17 }
 0x194   : > { %2406 = vmatmul.mubr.bf16.gmra.mxu1 %v807_v38 }
 0x195   : > { %2409 = vmatprep.mubr.bf16.mxu1 %v808_v39 }
 0x19c   : > { %2410 = vmatmul.mubr.bf16.gmra.mxu1 %v809_v42 }
 0x1fc   : > { %v2383_v43 = vpop.f32.mrf.mxu1 }
 0x1fe   : > { %v908_v44 = vpop.f32.mrf.mxu1 }
 0x200   : > { %v2384_v45 = vpop.f32.mrf.mxu1 }
 0x201   : > { %v2030_v46 = vpack.c.bf16 %v2384_v45, %v2383_v43 }
 0x202   : > { %v911_v48 = vpop.f32.mrf.mxu1 }
 0x203   : > { %2102 = vst [vmem:[#allocation2 + $0x8] sm:$0xff] %v2030_v46   ;;  %v2025_v49 = vpack.c.bf16 %v911_v48, %v908_v44 }
 0x205   : > { %2026 = vst [vmem:[#allocation2] sm:$0xff] %v2025_v49  }
 0x20c   : > { %v2387_v50 = vpop.f32.mrf.mxu1 }
 0x20e   : > { %v924_v51 = vpop.f32.mrf.mxu1 }
 0x210   : > { %v2388_v52 = vpop.f32.mrf.mxu1 }
 0x211   : > { %v2040_v59 = vpack.c.bf16 %v2388_v52, %v2387_v50 }
 0x212   : > { %v927_v53 = vpop.f32.mrf.mxu1 }
 0x213   : > { %2104 = vst [vmem:[#allocation2 + $0x18] sm:$0xff] %v2040_v59   ;;  %v2035_v55 = vpack.c.bf16 %v927_v53, %v924_v51 }
 0x215   : > { %2103 = vst [vmem:[#allocation2 + $0x10] sm:$0xff] %v2035_v55  }
 0x21c   : > { %v2391_v56 = vpop.f32.mrf.mxu1 }
 0x21e   : > { %v940_v57 = vpop.f32.mrf.mxu1 }
 0x220   : > { %v2392_v58 = vpop.f32.mrf.mxu1 }
 0x221   : > { %v2050_v60 = vpack.c.bf16 %v2392_v58, %v2391_v56 }
 0x222   : > { %v943_v62 = vpop.f32.mrf.mxu1 }
 0x223   : > { %2106 = vst [vmem:[#allocation2 + $0x28] sm:$0xff] %v2050_v60   ;;  %v2045_v63 = vpack.c.bf16 %v943_v62, %v940_v57 }
 0x225   : > { %2105 = vst [vmem:[#allocation2 + $0x20] sm:$0xff] %v2045_v63  }
 0x22c   : > { %v2395_v0 = vpop.f32.mrf.mxu1 }
 0x22e   : > { %v956_v1 = vpop.f32.mrf.mxu1 }
 0x230   : > { %v2396_v2 = vpop.f32.mrf.mxu1 }
 0x231   : > { %v2060_v3 = vpack.c.bf16 %v2396_v2, %v2395_v0 }
 0x232   : > { %v959_v5 = vpop.f32.mrf.mxu1 }
 0x233   : > { %2108 = vst [vmem:[#allocation2 + $0x38] sm:$0xff] %v2060_v3   ;;  %v2055_v6 = vpack.c.bf16 %v959_v5, %v956_v1 }
 0x235   : > { %2107 = vst [vmem:[#allocation2 + $0x30] sm:$0xff] %v2055_v6  }
 0x23c   : > { %v2399_v7 = vpop.f32.mrf.mxu1 }
 0x23e   : > { %v972_v8 = vpop.f32.mrf.mxu1 }
 0x240   : > { %v2400_v9 = vpop.f32.mrf.mxu1 }
 0x241   : > { %v2070_v11 = vpack.c.bf16 %v2400_v9, %v2399_v7 }
 0x242   : > { %v975_v12 = vpop.f32.mrf.mxu1 }
 0x243   : > { %2110 = vst [vmem:[#allocation2 + $0x48] sm:$0xff] %v2070_v11   ;;  %v2065_v13 = vpack.c.bf16 %v975_v12, %v972_v8 }
 0x245   : > { %2109 = vst [vmem:[#allocation2 + $0x40] sm:$0xff] %v2065_v13  }
 0x24c   : > { %v2403_v14 = vpop.f32.mrf.mxu1 }
 0x24e   : > { %v988_v15 = vpop.f32.mrf.mxu1 }
 0x250   : > { %v2404_v16 = vpop.f32.mrf.mxu1 }
 0x251   : > { %v2080_v18 = vpack.c.bf16 %v2404_v16, %v2403_v14 }
 0x252   : > { %v991_v47 = vpop.f32.mrf.mxu1 }
 0x253   : > { %2112 = vst [vmem:[#allocation2 + $0x58] sm:$0xff] %v2080_v18   ;;  %v2075_v54 = vpack.c.bf16 %v991_v47, %v988_v15 }
 0x254   : > { %v2407_v61 = vpop.f32.mrf.mxu1 }
 0x255   : > { %2111 = vst [vmem:[#allocation2 + $0x50] sm:$0xff] %v2075_v54  }
 0x256   : > { %v1004_v4 = vpop.f32.mrf.mxu1 }
 0x258   : > { %v2408_v19 = vpop.f32.mrf.mxu1 }
 0x259   : > { %v2090_v20 = vpack.c.bf16 %v2408_v19, %v2407_v61 }
 0x25a   : > { %v1007_v21 = vpop.f32.mrf.mxu1 }
 0x25b   : > { %2114 = vst [vmem:[#allocation2 + $0x68] sm:$0xff] %v2090_v20   ;;  %v2085_v22 = vpack.c.bf16 %v1007_v21, %v1004_v4 }
 0x25c   : > { %v2411_v24 = vpop.f32.mrf.mxu1 }
 0x25d   : > { %2113 = vst [vmem:[#allocation2 + $0x60] sm:$0xff] %v2085_v22  }
 0x25e   : > { %v1020_v25 = vpop.f32.mrf.mxu1 }
 0x260   : > { %v2412_v26 = vpop.f32.mrf.mxu1 }
 0x261   : > { %v2100_v27 = vpack.c.bf16 %v2412_v26, %v2411_v24 }
 0x262   : > { %v1023_v28 = vpop.f32.mrf.mxu1 }
 0x263   : > { %2116 = vst [vmem:[#allocation2 + $0x78] sm:$0xff] %v2100_v27   ;;  %v2095_v29 = vpack.c.bf16 %v1023_v28, %v1020_v25 }
 0x265   : > { %2115 = vst [vmem:[#allocation2 + $0x70] sm:$0xff] %v2095_v29  }
 0x266 PF: > { %p1936_p2 = scmp.ne.s32.totalorder %s2782_s18, 1 }
 0x268   : > { %1200 = sbr.rel (%p1936_p2) target bundleno = 914 (0x392), region = 60 }
 0x26d   : > { %v2590_v31 = vld [vmem:[#allocation2 + $0x78] sm:$0xff]   ;;  %v2592_v17 = vld [vmem:[#allocation2 + $0x70] sm:$0xff]   ;;  %v2594_v30 = vld [vmem:[#allocation2 + $0x68] sm:$0xff]  }
 0x26e   : > { %v2591_v10 = vld [vmem:[#allocation2 + $0x38] sm:$0xff]   ;;  %2253 = vmatprep.subr.bf16.mxu0 %v2590_v31  ;;  %2429 = vmatprep.subr.bf16.mxu1 %v2590_v31  ;;  %v2593_v23 = vld [vmem:[#allocation2 + $0x30] sm:$0xff]   ;;  %v2595_v32 = vld [vmem:[#allocation2 + $0x28] sm:$0xff]  }
 0x26f   : > { %2254 = vmatpush3.bf16.msra.mxu0 %v2591_v10  ;;  %2437 = vmatpush3.bf16.msra.mxu1 %v2591_v10  ;;  %v2596_v33 = vld [vmem:[#allocation2 + $0x60] sm:$0xff]   ;;  %v2598_v35 = vld [vmem:[#allocation2 + $0x58] sm:$0xff]   ;;  %v2600_v37 = vld [vmem:[#allocation2 + $0x50] sm:$0xff]  }
 0x270   : > { %2255 = vmatprep.subr.bf16.mxu0 %v2592_v17  ;;  %2430 = vmatprep.subr.bf16.mxu1 %v2592_v17  ;;  %v2597_v34 = vld [vmem:[#allocation2 + $0x20] sm:$0xff]   ;;  %v2599_v36 = vld [vmem:[#allocation2 + $0x18] sm:$0xff]   ;;  %v2601_v40 = vld [vmem:[#allocation2 + $0x10] sm:$0xff]  }
 0x271   : > { %v2608_v38 = vld [vmem:[#allocation3 + $0x4] ss:$8 sps:$4 sm:$0xff]   ;;  %v2606_v45 = vld [vmem:[#allocation3] ss:$8 sps:$4 sm:$0xff]   ;;  %v2612_v48 = vld [vmem:[#allocation3 + $0x14] ss:$8 sps:$4 sm:$0xff]  }
 0x272   : > { %v2611_v39 = vld [vmem:[#allocation3 + $0x84] ss:$8 sps:$4 sm:$0xff]   ;;  %1565 = vmatprep.mubr.bf16.mxu0 %v2608_v38  ;;  %v2609_v46 = vld [vmem:[#allocation3 + $0x80] ss:$8 sps:$4 sm:$0xff]   ;;  %v2614_v49 = vld [vmem:[#allocation3 + $0x94] ss:$8 sps:$4 sm:$0xff]  }
 0x273   : > { %2256 = vmatpush3.bf16.msra.mxu0 %v2593_v23  ;;  %2438 = vmatpush3.bf16.msra.mxu1 %v2593_v23  ;;  %v2602_v41 = vld [vmem:[#allocation2 + $0x48] sm:$0xff]   ;;  %v2604_v43 = vld [vmem:[#allocation2 + $0x40] sm:$0xff]   ;;  %v2616_v50 = vld [vmem:[#allocation3 + $0x10] ss:$8 sps:$4 sm:$0xff]  }
 0x274   : > { %2257 = vmatprep.subr.bf16.mxu0 %v2594_v30  ;;  %2431 = vmatprep.subr.bf16.mxu1 %v2594_v30  ;;  %v2603_v42 = vld [vmem:[#allocation2 + $0x8] sm:$0xff]   ;;  %v2605_v44 = vld [vmem:[#allocation2] sm:$0xff]   ;;  %v2617_v51 = vld [vmem:[#allocation3 + $0x90] ss:$8 sps:$4 sm:$0xff]  }
 0x275   : > { %1629 = vmatprep.mubr.bf16.mxu1 %v2611_v39  ;;  %v2618_v52 = vld [vmem:[#allocation3 + $0x24] ss:$8 sps:$4 sm:$0xff]   ;;  %v2622_v53 = vld [vmem:[#allocation3 + $0x20] ss:$8 sps:$4 sm:$0xff]   ;;  %v2624_v56 = vld [vmem:[#allocation3 + $0x34] ss:$8 sps:$4 sm:$0xff]  }
 0x276   : > { %v2620_v59 = vld [vmem:[#allocation3 + $0xa4] ss:$8 sps:$4 sm:$0xff]   ;;  %v2623_v55 = vld [vmem:[#allocation3 + $0xa0] ss:$8 sps:$4 sm:$0xff]   ;;  %v2626_v57 = vld [vmem:[#allocation3 + $0xb4] ss:$8 sps:$4 sm:$0xff]  }
 0x277   : > { %2258 = vmatpush3.bf16.msra.mxu0 %v2595_v32  ;;  %2439 = vmatpush3.bf16.msra.mxu1 %v2595_v32  ;;  %v2628_v58 = vld [vmem:[#allocation3 + $0x30] ss:$8 sps:$4 sm:$0xff]   ;;  %v2630_v62 = vld [vmem:[#allocation3 + $0x44] ss:$8 sps:$4 sm:$0xff]   ;;  %v2634_v0 = vld [vmem:[#allocation3 + $0x40] ss:$8 sps:$4 sm:$0xff]  }
 0x278   : > { %2259 = vmatprep.subr.bf16.mxu0 %v2596_v33  ;;  %2432 = vmatprep.subr.bf16.mxu1 %v2596_v33  ;;  %v2629_v60 = vld [vmem:[#allocation3 + $0xb0] ss:$8 sps:$4 sm:$0xff]   ;;  %v2632_v63 = vld [vmem:[#allocation3 + $0xc4] ss:$8 sps:$4 sm:$0xff]   ;;  %v2635_v1 = vld [vmem:[#allocation3 + $0xc0] ss:$8 sps:$4 sm:$0xff]  }
 0x279   : > { %v2636_v2 = vld [vmem:[#allocation3 + $0x54] ss:$8 sps:$4 sm:$0xff]   ;;  %v2640_v5 = vld [vmem:[#allocation3 + $0x50] ss:$8 sps:$4 sm:$0xff]   ;;  %v2642_v7 = vld [vmem:[#allocation3 + $0x64] ss:$8 sps:$4 sm:$0xff]  }
 0x27a   : > { %v2638_v3 = vld [vmem:[#allocation3 + $0xd4] ss:$8 sps:$4 sm:$0xff]   ;;  %v2641_v6 = vld [vmem:[#allocation3 + $0xd0] ss:$8 sps:$4 sm:$0xff]   ;;  %v2644_v8 = vld [vmem:[#allocation3 + $0xe4] ss:$8 sps:$4 sm:$0xff]  }
 0x27b   : > { %2260 = vmatpush3.bf16.msra.mxu0 %v2597_v34  ;;  %2440 = vmatpush3.bf16.msra.mxu1 %v2597_v34  ;;  %v2646_v9 = vld [vmem:[#allocation3 + $0x60] ss:$8 sps:$4 sm:$0xff]   ;;  %v2648_v12 = vld [vmem:[#allocation3 + $0x74] ss:$8 sps:$4 sm:$0xff]   ;;  %v2652_v14 = vld [vmem:[#allocation3 + $0x70] ss:$8 sps:$4 sm:$0xff]  }
 0x27c   : > { %2261 = vmatprep.subr.bf16.mxu0 %v2598_v35  ;;  %2433 = vmatprep.subr.bf16.mxu1 %v2598_v35  ;;  %v2647_v11 = vld [vmem:[#allocation3 + $0xe0] ss:$8 sps:$4 sm:$0xff]   ;;  %v2650_v13 = vld [vmem:[#allocation3 + $0xf4] ss:$8 sps:$4 sm:$0xff]   ;;  %v2653_v15 = vld [vmem:[#allocation3 + $0xf0] ss:$8 sps:$4 sm:$0xff]  }
 0x27d   : > { %v2980_v47 = vld [vmem:[%s3043_s4] ss:$0 sm:$0xff] }
 0x27f   : > { %2262 = vmatpush3.bf16.msra.mxu0 %v2599_v36  ;;  %2441 = vmatpush3.bf16.msra.mxu1 %v2599_v36 }
 0x280   : > { %2263 = vmatprep.subr.bf16.mxu0 %v2600_v37  ;;  %2434 = vmatprep.subr.bf16.mxu1 %v2600_v37 }
 0x283   : > { %2264 = vmatpush3.bf16.msra.mxu0 %v2601_v40  ;;  %2442 = vmatpush3.bf16.msra.mxu1 %v2601_v40 }
 0x284   : > { %2265 = vmatprep.subr.bf16.mxu0 %v2602_v41  ;;  %2435 = vmatprep.subr.bf16.mxu1 %v2602_v41 }
 0x287   : > { %2266 = vmatpush3.bf16.msra.mxu0 %v2603_v42  ;;  %2443 = vmatpush3.bf16.msra.mxu1 %v2603_v42 }
 0x288   : > { %2267 = vmatprep.subr.bf16.mxu0 %v2604_v43  ;;  %2436 = vmatprep.subr.bf16.mxu1 %v2604_v43 }
 0x28b   : > { %2268 = vmatpush3.bf16.msra.mxu0 %v2605_v44  ;;  %2444 = vmatpush3.bf16.msra.mxu1 %v2605_v44 }
 0x28e   : > { %1566 = vmatmul.mubr.bf16.vlgmr.msra.gmra.mxu0 %v2606_v45  ;;  %1630 = vmatmul.mubr.bf16.vlgmr.msra.gmra.mxu1 %v2609_v46 }
 0x28f   : > { %1573 = vmatprep.mubr.bf16.mxu0 %v2612_v48  ;;  %1637 = vmatprep.mubr.bf16.mxu1 %v2614_v49 }
 0x296   : > { %1574 = vmatmul.mubr.bf16.gmra.mxu0 %v2616_v50  ;;  %1638 = vmatmul.mubr.bf16.gmra.mxu1 %v2617_v51 }
 0x297   : > { %1581 = vmatprep.mubr.bf16.mxu0 %v2618_v52  ;;  %1645 = vmatprep.mubr.bf16.mxu1 %v2620_v59 }
 0x29e   : > { %1582 = vmatmul.mubr.bf16.gmra.mxu0 %v2622_v53  ;;  %1646 = vmatmul.mubr.bf16.gmra.mxu1 %v2623_v55 }
 0x29f   : > { %1589 = vmatprep.mubr.bf16.mxu0 %v2624_v56  ;;  %1653 = vmatprep.mubr.bf16.mxu1 %v2626_v57 }
 0x2a6   : > { %1590 = vmatmul.mubr.bf16.gmra.mxu0 %v2628_v58  ;;  %1654 = vmatmul.mubr.bf16.gmra.mxu1 %v2629_v60 }
 0x2a7   : > { %1597 = vmatprep.mubr.bf16.mxu0 %v2630_v62  ;;  %1661 = vmatprep.mubr.bf16.mxu1 %v2632_v63 }
 0x2ae   : > { %1598 = vmatmul.mubr.bf16.gmra.mxu0 %v2634_v0  ;;  %1662 = vmatmul.mubr.bf16.gmra.mxu1 %v2635_v1 }
 0x2af   : > { %1605 = vmatprep.mubr.bf16.mxu0 %v2636_v2  ;;  %1669 = vmatprep.mubr.bf16.mxu1 %v2638_v3 }
 0x2b6   : > { %1606 = vmatmul.mubr.bf16.gmra.mxu0 %v2640_v5  ;;  %1670 = vmatmul.mubr.bf16.gmra.mxu1 %v2641_v6 }
 0x2b7   : > { %1613 = vmatprep.mubr.bf16.mxu0 %v2642_v7  ;;  %1677 = vmatprep.mubr.bf16.mxu1 %v2644_v8 }
 0x2be   : > { %1614 = vmatmul.mubr.bf16.gmra.mxu0 %v2646_v9  ;;  %1678 = vmatmul.mubr.bf16.gmra.mxu1 %v2647_v11 }
 0x2bf   : > { %1621 = vmatprep.mubr.bf16.mxu0 %v2648_v12  ;;  %1685 = vmatprep.mubr.bf16.mxu1 %v2650_v13 }
 0x2c6   : > { %1622 = vmatmul.mubr.bf16.gmra.mxu0 %v2652_v14  ;;  %1686 = vmatmul.mubr.bf16.gmra.mxu1 %v2653_v15 }
 0x34e   : > { %v2269_v16 = vpop.f32.mrf.mxu0  ;;  %v2317_v18 = vpop.f32.mrf.mxu1 }
 0x350   : > { %v2270_v54 = vpop.f32.mrf.mxu0  ;;  %v2318_v61 = vpop.f32.mrf.mxu1 }
 0x351   : > { %v2271_v4 = vadd.f32 %v2270_v54, %v2269_v16  ;;  %v2319_v19 = vadd.f32 %v2318_v61, %v2317_v18 }
 0x352   : > { %v2272_v20 = vpop.f32.mrf.mxu0  ;;  %v2320_v21 = vpop.f32.mrf.mxu1 }
 0x353   : > { %v1568_v22 = vadd.f32 %v2271_v4, %v2980_v47  ;;  %v1632_v24 = vadd.f32 %v2319_v19, %v2980_v47 }
 0x354   : > { %v2273_v25 = vpop.f32.mrf.mxu0  ;;  %v2321_v26 = vpop.f32.mrf.mxu1 }
 0x355   : > { %1694 = vst [vmem:[#allocation9] sm:$0xff] %v1568_v22  ;;  %1710 = vst [vmem:[#allocation9 + $0x80] sm:$0xff] %v1632_v24  ;;  %v2274_v27 = vadd.f32 %v2273_v25, %v2272_v20  ;;  %v2322_v28 = vadd.f32 %v2321_v26, %v2320_v21 }
 0x356   : > { %v2275_v29 = vpop.f32.mrf.mxu0  ;;  %v2323_v31 = vpop.f32.mrf.mxu1 }
 0x357   : > { %v1571_v10 = vadd.f32 %v2274_v27, %v2980_v47  ;;  %v1635_v17 = vadd.f32 %v2322_v28, %v2980_v47 }
 0x358   : > { %v2276_v23 = vpop.f32.mrf.mxu0  ;;  %v2324_v30 = vpop.f32.mrf.mxu1 }
 0x359   : > { %1695 = vst [vmem:[#allocation9 + $0x8] sm:$0xff] %v1571_v10  ;;  %1711 = vst [vmem:[#allocation9 + $0x88] sm:$0xff] %v1635_v17  ;;  %v2277_v32 = vadd.f32 %v2276_v23, %v2275_v29  ;;  %v2325_v33 = vadd.f32 %v2324_v30, %v2323_v31 }
 0x35a   : > { %v2278_v34 = vpop.f32.mrf.mxu0  ;;  %v2326_v35 = vpop.f32.mrf.mxu1 }
 0x35b   : > { %v1576_v36 = vadd.f32 %v2277_v32, %v2980_v47  ;;  %v1640_v37 = vadd.f32 %v2325_v33, %v2980_v47 }
 0x35c   : > { %v2279_v38 = vpop.f32.mrf.mxu0  ;;  %v2327_v39 = vpop.f32.mrf.mxu1 }
 0x35d   : > { %1696 = vst [vmem:[#allocation9 + $0x10] sm:$0xff] %v1576_v36  ;;  %1712 = vst [vmem:[#allocation9 + $0x90] sm:$0xff] %v1640_v37  ;;  %v2280_v40 = vadd.f32 %v2279_v38, %v2278_v34  ;;  %v2328_v41 = vadd.f32 %v2327_v39, %v2326_v35 }
 0x35e   : > { %v2281_v42 = vpop.f32.mrf.mxu0  ;;  %v2329_v43 = vpop.f32.mrf.mxu1 }
 0x35f   : > { %v1579_v44 = vadd.f32 %v2280_v40, %v2980_v47  ;;  %v1643_v45 = vadd.f32 %v2328_v41, %v2980_v47 }
 0x360   : > { %v2282_v46 = vpop.f32.mrf.mxu0  ;;  %v2330_v48 = vpop.f32.mrf.mxu1 }
 0x361   : > { %1697 = vst [vmem:[#allocation9 + $0x18] sm:$0xff] %v1579_v44  ;;  %1713 = vst [vmem:[#allocation9 + $0x98] sm:$0xff] %v1643_v45  ;;  %v2283_v49 = vadd.f32 %v2282_v46, %v2281_v42  ;;  %v2331_v50 = vadd.f32 %v2330_v48, %v2329_v43 }
 0x362   : > { %v2284_v51 = vpop.f32.mrf.mxu0  ;;  %v2332_v52 = vpop.f32.mrf.mxu1 }
 0x363   : > { %v1584_v59 = vadd.f32 %v2283_v49, %v2980_v47  ;;  %v1648_v53 = vadd.f32 %v2331_v50, %v2980_v47 }
 0x364   : > { %v2285_v55 = vpop.f32.mrf.mxu0  ;;  %v2333_v56 = vpop.f32.mrf.mxu1 }
 0x365   : > { %1698 = vst [vmem:[#allocation9 + $0x20] sm:$0xff] %v1584_v59  ;;  %1714 = vst [vmem:[#allocation9 + $0xa0] sm:$0xff] %v1648_v53  ;;  %v2286_v57 = vadd.f32 %v2285_v55, %v2284_v51  ;;  %v2334_v58 = vadd.f32 %v2333_v56, %v2332_v52 }
 0x366   : > { %v2287_v60 = vpop.f32.mrf.mxu0  ;;  %v2335_v62 = vpop.f32.mrf.mxu1 }
 0x367   : > { %v1587_v63 = vadd.f32 %v2286_v57, %v2980_v47  ;;  %v1651_v0 = vadd.f32 %v2334_v58, %v2980_v47 }
 0x368   : > { %v2288_v1 = vpop.f32.mrf.mxu0  ;;  %v2336_v2 = vpop.f32.mrf.mxu1 }
 0x369   : > { %1699 = vst [vmem:[#allocation9 + $0x28] sm:$0xff] %v1587_v63  ;;  %1715 = vst [vmem:[#allocation9 + $0xa8] sm:$0xff] %v1651_v0  ;;  %v2289_v3 = vadd.f32 %v2288_v1, %v2287_v60  ;;  %v2337_v5 = vadd.f32 %v2336_v2, %v2335_v62 }
 0x36a   : > { %v2290_v6 = vpop.f32.mrf.mxu0  ;;  %v2338_v7 = vpop.f32.mrf.mxu1 }
 0x36b   : > { %v1592_v8 = vadd.f32 %v2289_v3, %v2980_v47  ;;  %v1656_v9 = vadd.f32 %v2337_v5, %v2980_v47 }
 0x36c   : > { %v2291_v11 = vpop.f32.mrf.mxu0  ;;  %v2339_v12 = vpop.f32.mrf.mxu1 }
 0x36d   : > { %1700 = vst [vmem:[#allocation9 + $0x30] sm:$0xff] %v1592_v8  ;;  %1716 = vst [vmem:[#allocation9 + $0xb0] sm:$0xff] %v1656_v9  ;;  %v2292_v13 = vadd.f32 %v2291_v11, %v2290_v6  ;;  %v2340_v14 = vadd.f32 %v2339_v12, %v2338_v7 }
 0x36e   : > { %v2293_v15 = vpop.f32.mrf.mxu0  ;;  %v2341_v16 = vpop.f32.mrf.mxu1 }
 0x36f   : > { %v1595_v18 = vadd.f32 %v2292_v13, %v2980_v47  ;;  %v1659_v54 = vadd.f32 %v2340_v14, %v2980_v47 }
 0x370   : > { %v2294_v61 = vpop.f32.mrf.mxu0  ;;  %v2342_v4 = vpop.f32.mrf.mxu1 }
 0x371   : > { %1701 = vst [vmem:[#allocation9 + $0x38] sm:$0xff] %v1595_v18  ;;  %1717 = vst [vmem:[#allocation9 + $0xb8] sm:$0xff] %v1659_v54  ;;  %v2295_v19 = vadd.f32 %v2294_v61, %v2293_v15  ;;  %v2343_v20 = vadd.f32 %v2342_v4, %v2341_v16 }
 0x372   : > { %v2296_v21 = vpop.f32.mrf.mxu0  ;;  %v2344_v22 = vpop.f32.mrf.mxu1 }
 0x373   : > { %v1600_v24 = vadd.f32 %v2295_v19, %v2980_v47  ;;  %v1664_v25 = vadd.f32 %v2343_v20, %v2980_v47 }
 0x374   : > { %v2297_v26 = vpop.f32.mrf.mxu0  ;;  %v2345_v27 = vpop.f32.mrf.mxu1 }
 0x375   : > { %1702 = vst [vmem:[#allocation9 + $0x40] sm:$0xff] %v1600_v24  ;;  %1718 = vst [vmem:[#allocation9 + $0xc0] sm:$0xff] %v1664_v25  ;;  %v2298_v28 = vadd.f32 %v2297_v26, %v2296_v21  ;;  %v2346_v29 = vadd.f32 %v2345_v27, %v2344_v22 }
 0x376   : > { %v2299_v31 = vpop.f32.mrf.mxu0  ;;  %v2347_v10 = vpop.f32.mrf.mxu1 }
 0x377   : > { %v1603_v17 = vadd.f32 %v2298_v28, %v2980_v47  ;;  %v1667_v23 = vadd.f32 %v2346_v29, %v2980_v47 }
 0x378   : > { %v2300_v30 = vpop.f32.mrf.mxu0  ;;  %v2348_v32 = vpop.f32.mrf.mxu1 }
 0x379   : > { %1703 = vst [vmem:[#allocation9 + $0x48] sm:$0xff] %v1603_v17  ;;  %1719 = vst [vmem:[#allocation9 + $0xc8] sm:$0xff] %v1667_v23  ;;  %v2301_v33 = vadd.f32 %v2300_v30, %v2299_v31  ;;  %v2349_v34 = vadd.f32 %v2348_v32, %v2347_v10 }
 0x37a   : > { %v2302_v35 = vpop.f32.mrf.mxu0  ;;  %v2350_v36 = vpop.f32.mrf.mxu1 }
 0x37b   : > { %v1608_v37 = vadd.f32 %v2301_v33, %v2980_v47  ;;  %v1672_v38 = vadd.f32 %v2349_v34, %v2980_v47 }
 0x37c   : > { %v2303_v39 = vpop.f32.mrf.mxu0  ;;  %v2351_v40 = vpop.f32.mrf.mxu1 }
 0x37d   : > { %1704 = vst [vmem:[#allocation9 + $0x50] sm:$0xff] %v1608_v37  ;;  %1720 = vst [vmem:[#allocation9 + $0xd0] sm:$0xff] %v1672_v38  ;;  %v2304_v41 = vadd.f32 %v2303_v39, %v2302_v35  ;;  %v2352_v42 = vadd.f32 %v2351_v40, %v2350_v36 }
 0x37e   : > { %v2305_v43 = vpop.f32.mrf.mxu0  ;;  %v2353_v44 = vpop.f32.mrf.mxu1 }
 0x37f   : > { %v1611_v45 = vadd.f32 %v2304_v41, %v2980_v47  ;;  %v1675_v46 = vadd.f32 %v2352_v42, %v2980_v47 }
 0x380   : > { %v2306_v48 = vpop.f32.mrf.mxu0  ;;  %v2354_v49 = vpop.f32.mrf.mxu1 }
 0x381   : > { %1705 = vst [vmem:[#allocation9 + $0x58] sm:$0xff] %v1611_v45  ;;  %1721 = vst [vmem:[#allocation9 + $0xd8] sm:$0xff] %v1675_v46  ;;  %v2307_v50 = vadd.f32 %v2306_v48, %v2305_v43  ;;  %v2355_v51 = vadd.f32 %v2354_v49, %v2353_v44 }
 0x382   : > { %v2308_v52 = vpop.f32.mrf.mxu0  ;;  %v2356_v59 = vpop.f32.mrf.mxu1 }
 0x383   : > { %v1616_v53 = vadd.f32 %v2307_v50, %v2980_v47  ;;  %v1680_v55 = vadd.f32 %v2355_v51, %v2980_v47 }
 0x384   : > { %v2309_v56 = vpop.f32.mrf.mxu0  ;;  %v2357_v57 = vpop.f32.mrf.mxu1 }
 0x385   : > { %1706 = vst [vmem:[#allocation9 + $0x60] sm:$0xff] %v1616_v53  ;;  %1722 = vst [vmem:[#allocation9 + $0xe0] sm:$0xff] %v1680_v55  ;;  %v2310_v58 = vadd.f32 %v2309_v56, %v2308_v52  ;;  %v2358_v60 = vadd.f32 %v2357_v57, %v2356_v59 }
 0x386   : > { %v2311_v62 = vpop.f32.mrf.mxu0  ;;  %v2359_v63 = vpop.f32.mrf.mxu1 }
 0x387   : > { %v1619_v0 = vadd.f32 %v2310_v58, %v2980_v47  ;;  %v1683_v1 = vadd.f32 %v2358_v60, %v2980_v47 }
 0x388   : > { %v2312_v2 = vpop.f32.mrf.mxu0  ;;  %v2360_v3 = vpop.f32.mrf.mxu1 }
 0x389   : > { %1707 = vst [vmem:[#allocation9 + $0x68] sm:$0xff] %v1619_v0  ;;  %1723 = vst [vmem:[#allocation9 + $0xe8] sm:$0xff] %v1683_v1  ;;  %v2313_v5 = vadd.f32 %v2312_v2, %v2311_v62  ;;  %v2361_v6 = vadd.f32 %v2360_v3, %v2359_v63 }
 0x38a   : > { %v2314_v7 = vpop.f32.mrf.mxu0  ;;  %v2362_v8 = vpop.f32.mrf.mxu1 }
 0x38b   : > { %v1624_v9 = vadd.f32 %v2313_v5, %v2980_v47  ;;  %v1688_v11 = vadd.f32 %v2361_v6, %v2980_v47 }
 0x38c   : > { %v2315_v12 = vpop.f32.mrf.mxu0  ;;  %v2363_v13 = vpop.f32.mrf.mxu1 }
 0x38d   : > { %1708 = vst [vmem:[#allocation9 + $0x70] sm:$0xff] %v1624_v9  ;;  %1724 = vst [vmem:[#allocation9 + $0xf0] sm:$0xff] %v1688_v11  ;;  %v2316_v14 = vadd.f32 %v2315_v12, %v2314_v7  ;;  %v2364_v15 = vadd.f32 %v2363_v13, %v2362_v8 }
 0x38f   : > { %v1627_v16 = vadd.f32 %v2316_v14, %v2980_v47  ;;  %v1691_v18 = vadd.f32 %v2364_v15, %v2980_v47 }
 0x391   : > { %1709 = vst [vmem:[#allocation9 + $0x78] sm:$0xff] %v1627_v16  ;;  %1725 = vst [vmem:[#allocation9 + $0xf8] sm:$0xff] %v1691_v18 }
 0x392 PF: > { %p3016_p3 = scmp.eq.s32.totalorder %s1836_s23, 1  ;;  %s2799_s7 = smov [#allocation9]  }
 0x393   : > { %s1741_s8 = sshll.u32 %s2799_s7, 4  ;;  %s1742_s8 = int_to_ptr.vmem [resolvable:$true] %s1741_s8 }
 0x394   : > { %s2732_s9 = scalar_lea.vmem %s1742_s8, 4096  ;;  %s2738_s10 = scalar_lea.vmem %s1742_s8, 8192 }
 0x395   : > { %p2733_p5 = scmp.ne.s32.totalorder %s1742_s8, %s2732_s9  ;;  %p2739_p12 = scmp.lt.s32.totalorder %s1742_s8, %s1742_s8 }
 0x396   : > { %p2740_p6 = scmp.lt.s32.totalorder %s2738_s10, %s2732_s9 }
 0x397   : > { %p2734_p10 = pnand %p2733_p5, %p3016_p3 }
 0x398   : > { %p2741_p13 = por %p2740_p6, %p2739_p12 }
 0x399   : > { %p2735_p11 = pneg %p2734_p10 }
 0x39b   : > { %p2742_p0 = pnand %p2741_p13, %p2735_p11 }
 0x39d   : > { %2745 = shalt.err (!%p2742_p0)
}
 0x39e   : > { %s2800_s11 = smov 128   ;;  %s2801_s23 = smov 8  }
 0x39f   : > { %2458 = dma.vmem_to_hbm [thread:$0]  (%p3016_p3), %s1742_s8, 4096, %s3044_s5, [#allocation5], %s2800_s11, %s2800_s11, %s2801_s23  }
 0x3a0 PF: > { %p2482_p1 = scmp.ge.s32.totalorder %s2790_s20, 2  ;;  %p2483_p4 = scmp.eq.s32.totalorder %s1837_s24, 1 }
 0x3a2   : > { %p2472_p8 = pnand %p2483_p4, %p2482_p1 }
 0x3a4   : > { %p2473_p9 = pneg %p2472_p8 }
 0x3a6   : > { %2777 = dma.done.wait (%p2473_p9), [#allocation5], 4096  }
 0x3a7   : > { %2779 = vsyncadd (%p2473_p9), [#allocation5], 4294963200  ;;  %s20_s20 = sadd.s32 1, %s2790_s20   ;;  %s3050_s18 = smov %s2786_s19 }
 0x3a8   : > { %p17_p7 = scmp.ge.s32.totalorder %s20_s20, 4   ;;  %s3051_s19 = smov %s3053_s28 }
 0x3aa   :  { %19 = sbr.rel (!%p17_p7) target bundleno = 5 (0x5), region = 96 }
 0x3af   :  { %1762 = vsyncpa [#allocation4], 1 }
 0x3b0   :  { %1764 = vsyncpa [#allocation4 + $0x1], 1 }
 0x3b1   :  { %1765 = vsyncpa [#allocation7], 1 }
 0x3b2   :  { %1766 = vsyncpa [#allocation5], 1 }
 0x3b3   :  { %1768 = vsyncpa [#allocation5 + $0x1], 1 }

</bundles_post_ra>
